<compile_context>
chip_gen: v5e
topology: v5e:2x2
jax: 0.10.0
libtpu: 0.0.40
codegen_flags: <defaults>
</compile_context>

<pallas_src>
import functools

import jax
import jax.numpy as jnp
from jax import lax
from jax.experimental import pallas as pl
from jax.experimental.pallas import tpu as pltpu

LANE = 128


def _round_up(x, m):
    return (x + m - 1) // m * m


def _vmem_capacity_bytes():
    """Physical VMEM per TensorCore; falls back to the smallest (v7x, 64 MiB)."""
    try:
        cap = getattr(pltpu.get_tpu_info(), "vmem_capacity_bytes", None)
        if cap:
            return int(cap)
    except Exception:
        pass
    return 64 * 1024 * 1024


# ---------------------------------------------------------------------------
# Kernels
# ---------------------------------------------------------------------------

def _epilogue(feats, no_imgnorm, use_abs):
    if not no_imgnorm:
        # l2norm: x / sqrt(sum_j x^2) == x * rsqrt(sum_j x^2); rsqrt -> EUP slot.
        # No eps, matching the PyTorch reference exactly.
        feats = feats * lax.rsqrt(jnp.sum(feats * feats, axis=1, keepdims=True))
    if use_abs:
        feats = jnp.abs(feats)
    return feats


def _resident_kernel(x_ref, w_ref, b_ref, o_ref, *, no_imgnorm, use_abs):
    # x_ref: [TILE_B, K_P]      w_ref: [K_P, EMBED_P]  (whole weight, VMEM-resident)
    # b_ref: [1, EMBED_P] f32   o_ref: [TILE_B, EMBED_P]
    feats = jnp.dot(x_ref[...], w_ref[...],
                    preferred_element_type=jnp.float32) + b_ref[...]
    o_ref[...] = _epilogue(feats, no_imgnorm, use_abs).astype(o_ref.dtype)


def _ktiled_kernel(x_ref, w_ref, b_ref, o_ref, acc_ref, *, no_imgnorm, use_abs):
    # Fallback when the whole weight does not fit in VMEM.
    # x_ref: [TILE_B, TILE_K]  w_ref: [TILE_K, EMBED_P]  acc_ref: f32 scratch
    k = pl.program_id(1)

    @pl.when(k == 0)
    def _():
        # Fold the bias into the accumulator init (saves an epilogue add).
        acc_ref[...] = jnp.zeros_like(acc_ref) + b_ref[...]

    acc_ref[...] += jnp.dot(x_ref[...], w_ref[...],
                            preferred_element_type=jnp.float32)

    @pl.when(k == pl.num_programs(1) - 1)
    def _():
        o_ref[...] = _epilogue(acc_ref[...], no_imgnorm,
                               use_abs).astype(o_ref.dtype)


# ---------------------------------------------------------------------------
# One-time parameter preparation (model init) + forward wrapper
# ---------------------------------------------------------------------------

def prepare_encoder_params(weight, bias, *, matmul_dtype=None):
    """One-time (model-init) parameter prep.

    weight: [embed, img_dim] (PyTorch Linear layout), bias: [embed].
    Pads embed/img_dim to lane-dense multiples of 128, transposes the weight
    to [img_dim_p, embed_p] so the kernel uses the canonical K-major MXU
    contraction, and optionally casts it to `matmul_dtype` (e.g. bf16).
    Doing this per forward call would burn a full extra HBM read+write of the
    weight every step."""
    embed_size, img_dim = weight.shape
    assert bias.shape == (embed_size,)
    embed_p = _round_up(embed_size, LANE)
    img_dim_p = _round_up(img_dim, LANE)

    w = jnp.pad(weight, ((0, embed_p - embed_size), (0, img_dim_p - img_dim)))
    w = jnp.asarray(w.T)                                  # [img_dim_p, embed_p]
    if matmul_dtype is not None:
        w = w.astype(matmul_dtype)
    b = jnp.pad(bias, (0, embed_p - embed_size)).reshape(1, embed_p)
    return w, b.astype(jnp.float32)


def encoder_image_precomp(images, w_prep, b_prep, *, embed_size,
                          no_imgnorm=False, use_abs=False,
                          force_ktiled=False, force_tile_k=None):
    """images: [B, img_dim]; (w_prep, b_prep) from prepare_encoder_params.
    Returns [B, embed_size] in images.dtype."""
    B, img_dim = images.shape
    img_dim_p, embed_p = w_prep.shape
    assert img_dim <= img_dim_p and embed_size <= embed_p
    assert b_prep.shape == (1, embed_p)

    out_dtype = images.dtype
    in_item = jnp.dtype(w_prep.dtype).itemsize
    out_item = jnp.dtype(out_dtype).itemsize
    # bf16 packs 16 rows per sublane-packed vreg; keep batch tiles aligned.
    sub = 16 if in_item == 2 else 8

    cap = _vmem_capacity_bytes()
    budget = int(0.875 * cap)          # ~56 MiB on v7x, ~112 MiB on v5e/v6e

    x = images
    if x.dtype != w_prep.dtype:        # feed the MXU in the weight's dtype
        x = x.astype(w_prep.dtype)

    # ---- Path A: whole weight VMEM-resident, grid over batch tiles only ----
    def _resident_bytes(tb):
        # With a constant index_map the weight is DMA'd from HBM only once,
        # but Pallas still reserves double buffers for it; account for both.
        # (pl.Buffered(1) on the weight spec would halve this reservation.)
        return (2 * img_dim_p * embed_p * in_item      # weight buffers
                + 2 * tb * img_dim_p * in_item         # x tiles (2 bufs)
                + 2 * tb * embed_p * out_item          # out tiles (2 bufs)
                + 2 * embed_p * 4)                     # bias

    cand = sorted({min(c, _round_up(B, sub)) for c in (1024, 512, 256)},
                  reverse=True)
    tile_b_res = next((tb for tb in cand if _resident_bytes(tb) <= budget), None)

    if tile_b_res is not None and not force_ktiled:
        tile_b = tile_b_res
        b_pad = _round_up(B, tile_b)
        x = jnp.pad(x, ((0, b_pad - B), (0, img_dim_p - img_dim)))
        kernel = functools.partial(_resident_kernel,
                                   no_imgnorm=no_imgnorm, use_abs=use_abs)
        out = pl.pallas_call(
            kernel,
            out_shape=jax.ShapeDtypeStruct((b_pad, embed_p), out_dtype),
            grid_spec=pltpu.PrefetchScalarGridSpec(
                num_scalar_prefetch=0,
                grid=(b_pad // tile_b,),
                in_specs=[
                    pl.BlockSpec((tile_b, img_dim_p), lambda i: (i, 0)),
                    pl.BlockSpec((img_dim_p, embed_p), lambda i: (0, 0)),
                    pl.BlockSpec((1, embed_p), lambda i: (0, 0)),
                ],
                out_specs=pl.BlockSpec((tile_b, embed_p), lambda i: (i, 0)),
            ),
            compiler_params=pltpu.CompilerParams(
                dimension_semantics=("parallel",),
                vmem_limit_bytes=budget),
        )(x, w_prep, b_prep)
        return out[:B, :embed_size]

    # ---- Path B: K-tiled fallback with an f32 accumulator ------------------
    if force_tile_k is not None:
        tile_k = force_tile_k
        assert tile_k % LANE == 0 and img_dim_p % tile_k == 0
    else:
        if img_dim_p <= 2048:
            tile_k = img_dim_p
        else:
            tile_k = max(t for t in range(LANE, 2048 + 1, LANE)
                         if img_dim_p % t == 0)

    if B >= 512:
        tile_b = 512
    elif B >= 256:
        tile_b = 256
    else:
        tile_b = _round_up(B, sub)

    def _ktiled_bytes(tb, tk):
        return (2 * tb * tk * in_item + 2 * tk * embed_p * in_item
                + 2 * tb * embed_p * out_item + tb * embed_p * 4
                + 2 * embed_p * 4)

    while tile_b > 64 and _ktiled_bytes(tile_b, tile_k) > budget:
        tile_b = _round_up(tile_b // 2, sub)

    b_pad = _round_up(B, tile_b)
    x = jnp.pad(x, ((0, b_pad - B), (0, img_dim_p - img_dim)))
    kernel = functools.partial(_ktiled_kernel,
                               no_imgnorm=no_imgnorm, use_abs=use_abs)
    out = pl.pallas_call(
        kernel,
        out_shape=jax.ShapeDtypeStruct((b_pad, embed_p), out_dtype),
        grid_spec=pltpu.PrefetchScalarGridSpec(
            num_scalar_prefetch=0,
            grid=(b_pad // tile_b, img_dim_p // tile_k),   # reduction axis last
            in_specs=[
                pl.BlockSpec((tile_b, tile_k), lambda i, k: (i, k)),
                pl.BlockSpec((tile_k, embed_p), lambda i, k: (k, 0)),
                pl.BlockSpec((1, embed_p), lambda i, k: (0, 0)),
            ],
            out_specs=pl.BlockSpec((tile_b, embed_p), lambda i, k: (i, 0)),
            scratch_shapes=[pltpu.VMEM((tile_b, embed_p), jnp.float32)],
        ),
        compiler_params=pltpu.CompilerParams(
            dimension_semantics=("parallel", "arbitrary"),
            vmem_limit_bytes=budget),
    )(x, w_prep, b_prep)
    return out[:B, :embed_size]


# ---------------------------------------------------------------------------
# Init + pure-JAX reference + demo
# ---------------------------------------------------------------------------

def init_weights(key, img_dim, embed_size):
    """Xavier-uniform init matching EncoderImagePrecomp.init_weights."""
    r = jnp.sqrt(6.0) / jnp.sqrt(img_dim + embed_size)
    weight = jax.random.uniform(key, (embed_size, img_dim),
                                minval=-r, maxval=r, dtype=jnp.float32)
    bias = jnp.zeros((embed_size,), dtype=jnp.float32)
    return weight, bias


def _reference(images, weight, bias, no_imgnorm=False, use_abs=False):
    feats = images @ weight.T + bias
    if not no_imgnorm:
        norm = jnp.sqrt(jnp.sum(feats ** 2, axis=1, keepdims=True))
        feats = feats / norm
    if use_abs:
        feats = jnp.abs(feats)
    return feats


if __name__ == "__main__":
    key = jax.random.PRNGKey(0)
    k_x, k_w, k_x2, k_w2, k_b2 = jax.random.split(key, 5)

    # --- Path A (VMEM-resident weight), small unaligned shapes -------------
    B, img_dim, embed_size = 8, 64, 32
    images = jax.random.normal(k_x, (B, img_dim), dtype=jnp.float32)
    weight, bias = init_weights(k_w, img_dim, embed_size)
    w_prep, b_prep = prepare_encoder_params(weight, bias)

    ok = True
    for no_imgnorm, use_abs in [(False, False), (False, True), (True, False)]:
        out = encoder_image_precomp(images, w_prep, b_prep,
                                    embed_size=embed_size,
                                    no_imgnorm=no_imgnorm, use_abs=use_abs)
        out = jax.block_until_ready(out)
        ref = _reference(images, weight, bias, no_imgnorm, use_abs)
        ok &= out.shape == (B, embed_size)
        ok &= bool(jnp.allclose(out, ref, atol=1e-5, rtol=1e-5))

    # --- Path B (K-tiled fallback), num_k > 1, nonzero bias -----------------
    B2, img_dim2, embed2 = 16, 256, 96
    images2 = jax.random.normal(k_x2, (B2, img_dim2), dtype=jnp.float32)
    weight2, _ = init_weights(k_w2, img_dim2, embed2)
    bias2 = 0.1 * jax.random.normal(k_b2, (embed2,), dtype=jnp.float32)
    w_prep2, b_prep2 = prepare_encoder_params(weight2, bias2)
    out2 = encoder_image_precomp(images2, w_prep2, b_prep2, embed_size=embed2,
                                 force_ktiled=True, force_tile_k=128)
    out2 = jax.block_until_ready(out2)
    ref2 = _reference(images2, weight2, bias2)
    ok &= out2.shape == (B2, embed2)
    ok &= bool(jnp.allclose(out2, ref2, atol=1e-5, rtol=1e-5))

    assert ok
    print("KERNEL_OK")
</pallas_src>

<mosaic_0001>
module attributes {stable_mosaic.version = 11 : i64} {
  func.func @_resident_kernel(%arg0: i32, %arg1: memref<8x128xf32, #tpu.memory_space<vmem>>, %arg2: memref<128x128xf32, #tpu.memory_space<vmem>>, %arg3: memref<1x128xf32, #tpu.memory_space<vmem>>, %arg4: memref<8x128xf32, #tpu.memory_space<vmem>>) attributes {dimension_semantics = [#tpu.dimension_semantics<parallel>], iteration_bounds = array<i64: 1>, scalar_prefetch = 0 : i64, scratch_operands = 0 : i64, tpu.core_type = #tpu.core_type<tc>, window_params = [{transform_indices = @transform_0, window_bounds = array<i64: 8, 128>}, {pipeline_mode = #tpu.pipeline_mode<synchronous>, transform_indices = @transform_1, window_bounds = array<i64: 128, 128>}, {pipeline_mode = #tpu.pipeline_mode<synchronous>, transform_indices = @transform_2, window_bounds = array<i64: 1, 128>}, {transform_indices = @transform_3, window_bounds = array<i64: 8, 128>}]} {
    %c0 = arith.constant 0 : index
    %c0_0 = arith.constant 0 : index
    %0 = vector.load %arg1[%c0, %c0_0] : memref<8x128xf32, #tpu.memory_space<vmem>>, vector<8x128xf32>
    %c0_1 = arith.constant 0 : index
    %c0_2 = arith.constant 0 : index
    %1 = vector.load %arg2[%c0_1, %c0_2] : memref<128x128xf32, #tpu.memory_space<vmem>>, vector<128x128xf32>
    %cst = arith.constant dense<0.000000e+00> : vector<8x128xf32>
    %2 = tpu.matmul %0, %1, %cst {dimension_numbers = #tpu.dot_dimension_numbers<[1], [0], [0], [1], [0, 0, 1, 1], [], []>} : vector<8x128xf32>, vector<128x128xf32>, vector<8x128xf32> -> vector<8x128xf32>
    %c0_3 = arith.constant 0 : index
    %c0_4 = arith.constant 0 : index
    %3 = vector.load %arg3[%c0_3, %c0_4] : memref<1x128xf32, #tpu.memory_space<vmem>>, vector<1x128xf32>
    %4 = vector.broadcast %3 : vector<1x128xf32> to vector<8x128xf32>
    %5 = arith.addf %2, %4 : vector<8x128xf32>
    %6 = arith.mulf %5, %5 : vector<8x128xf32>
    %cst_5 = arith.constant dense<0.000000e+00> : vector<8xf32>
    %7 = vector.multi_reduction <add>, %6, %cst_5 [1] : vector<8x128xf32> to vector<8xf32>
    %8 = vector.shape_cast %7 : vector<8xf32> to vector<8x1xf32>
    %9 = math.rsqrt %8 : vector<8x1xf32>
    %10 = vector.broadcast %9 : vector<8x1xf32> to vector<8x128xf32>
    %11 = arith.mulf %5, %10 : vector<8x128xf32>
    %c0_6 = arith.constant 0 : index
    %c0_7 = arith.constant 0 : index
    %12 = vector.load %arg4[%c0_6, %c0_7] : memref<8x128xf32, #tpu.memory_space<vmem>>, vector<8x128xf32>
    tpu.vector_store %arg4[%c0_6, %c0_7], %11 {strides = array<i32>} : memref<8x128xf32, #tpu.memory_space<vmem>>, vector<8x128xf32>,
    return
  }
  func.func @transform_0(%arg0: i32) -> (i32, i32) {
    %c0_i32 = arith.constant 0 : i32
    %c0_i32_0 = arith.constant 0 : i32
    return %arg0, %c0_i32 : i32, i32
  }
  func.func @transform_1(%arg0: i32) -> (i32, i32) {
    %c0_i32 = arith.constant 0 : i32
    %c0_i32_0 = arith.constant 0 : i32
    %c0_i32_1 = arith.constant 0 : i32
    return %c0_i32, %c0_i32_0 : i32, i32
  }
  func.func @transform_2(%arg0: i32) -> (i32, i32) {
    %c0_i32 = arith.constant 0 : i32
    %c0_i32_0 = arith.constant 0 : i32
    %c0_i32_1 = arith.constant 0 : i32
    return %c0_i32, %c0_i32_0 : i32, i32
  }
  func.func @transform_3(%arg0: i32) -> (i32, i32) {
    %c0_i32 = arith.constant 0 : i32
    %c0_i32_0 = arith.constant 0 : i32
    return %arg0, %c0_i32 : i32, i32
  }
}

</mosaic_0001>

<bundles_post_ra>
// kernel: tpu_custom_call.1
= control target key start
LH: loop header
LB: loop body
LE: loop exit
PB: predicated region body
PF: predicated region fallthrough
CT: control target
= control target key end

     0   :  { %8 = vsyncpa [#allocation3], 0  ;;  %s242_s0 = inlined_call_operand.hbm [shape: f32[8,128], index: 0, kind: input, shape index: {}]   ;;  %s243_s1 = inlined_call_operand.hbm [shape: f32[128,128], index: 1, kind: input, shape index: {}]   ;;  %s244_s2 = inlined_call_operand.vmem [shape: f32[1,128], index: 2, kind: input, shape index: {}]   ;;  %s245_s3 = inlined_call_operand.hbm [shape: f32[8,128], index: 3, kind: output, shape index: {}]  }
   0x1   :  { %9 = vsyncpa [#allocation6], 0 }
   0x2   :  { %10 = vsyncpa [#allocation4], 0  ;;  %s16_s14 = sshll.u32 %s242_s0, 4  ;;  %s205_s15 = smov [#allocation2]   ;;  %s17_s14 = int_to_ptr.hbm [resolvable:$true] %s16_s14 }
   0x3   :  { %s18_s16 = sshll.u32 %s205_s15, 4  ;;  %s26_s19 = sshll.u32 %s243_s1, 4  ;;  %s19_s16 = int_to_ptr.vmem [resolvable:$true] %s18_s16  ;;  %s27_s19 = int_to_ptr.hbm [resolvable:$true] %s26_s19 }
   0x4   :  { %21 = dma.hbm_to_vmem [thread:$0]  %s17_s14, 128, %s19_s16, [#allocation3]  }
   0x5   :  { %s206_s20 = smov [#allocation5]   ;;  %s207_s22 = smov 128  }
   0x6   :  { %s28_s21 = sshll.u32 %s206_s20, 4  ;;  %s208_s23 = smov 8   ;;  %s29_s21 = int_to_ptr.vmem [resolvable:$true] %s28_s21 }
   0x7   :  { %34 = dma.hbm_to_vmem [thread:$0]  %s27_s19, 2048, %s29_s21, [#allocation6], %s207_s22, %s207_s22, %s208_s23  }
   0x8   :  { %199 = dma.done.wait [#allocation3], 128  }
   0x9   :  { %200 = vsyncadd [#allocation3], 4294967168 }
   0xa   :  { %201 = dma.done.wait [#allocation6], 2048  }
   0xb   :  { %202 = vsyncadd [#allocation6], 4294965248  ;;  %v61_v0 = vld [vmem:[#allocation5 + $0x78] sm:$0xff]  ;;  %v60_v1 = vld [vmem:[#allocation5 + $0x70] sm:$0xff]  ;;  %s209_s24 = smov [#allocation7]  }
   0xc   :  { %66 = vmatpush.msra.mxu0 %v61_v0  ;;  %v59_v2 = vld [vmem:[#allocation5 + $0x68] sm:$0xff]  ;;  %v58_v3 = vld [vmem:[#allocation5 + $0x60] sm:$0xff]  ;;  %v57_v4 = vld [vmem:[#allocation5 + $0x58] sm:$0xff]  ;;  %s106_s25 = sshll.u32 %s209_s24, 4  ;;  %s107_s25 = int_to_ptr.vmem [resolvable:$true] %s106_s25 }
   0xd   :  { %v56_v5 = vld [vmem:[#allocation5 + $0x50] sm:$0xff]  ;;  %v55_v6 = vld [vmem:[#allocation5 + $0x48] sm:$0xff]  ;;  %v54_v7 = vld [vmem:[#allocation5 + $0x40] sm:$0xff] }
   0xe   :  { %67 = vmatpush.msra.mxu0 %v60_v1  ;;  %v53_v8 = vld [vmem:[#allocation5 + $0x38] sm:$0xff]  ;;  %v52_v9 = vld [vmem:[#allocation5 + $0x30] sm:$0xff]  ;;  %v51_v10 = vld [vmem:[#allocation5 + $0x28] sm:$0xff] }
   0xf   :  { %v50_v11 = vld [vmem:[#allocation5 + $0x20] sm:$0xff]  ;;  %v49_v12 = vld [vmem:[#allocation5 + $0x18] sm:$0xff]  ;;  %v48_v13 = vld [vmem:[#allocation5 + $0x10] sm:$0xff] }
  0x10   :  { %68 = vmatpush.msra.mxu0 %v59_v2  ;;  %v47_v14 = vld [vmem:[#allocation5 + $0x8] sm:$0xff]  ;;  %v46_v15 = vld [vmem:[#allocation5] sm:$0xff]  ;;  %v45_v16 = vld [vmem:[#allocation2] sm:$0xff] }
  0x11   :  { %v124_v17 = vld [vmem:[%s244_s2] ss:$0 sm:$0xff]  ;;  %s108_s2 = sshll.u32 %s245_s3, 4  ;;  %s109_s2 = int_to_ptr.hbm [resolvable:$true] %s108_s2 }
  0x12   :  { %69 = vmatpush.msra.mxu0 %v58_v3 }
  0x14   :  { %70 = vmatpush.msra.mxu0 %v57_v4 }
  0x16   :  { %71 = vmatpush.msra.mxu0 %v56_v5 }
  0x18   :  { %72 = vmatpush.msra.mxu0 %v55_v6 }
  0x1a   :  { %73 = vmatpush.msra.mxu0 %v54_v7 }
  0x1c   :  { %74 = vmatpush.msra.mxu0 %v53_v8 }
  0x1e   :  { %75 = vmatpush.msra.mxu0 %v52_v9 }
  0x20   :  { %76 = vmatpush.msra.mxu0 %v51_v10 }
  0x22   :  { %77 = vmatpush.msra.mxu0 %v50_v11 }
  0x24   :  { %78 = vmatpush.msra.mxu0 %v49_v12 }
  0x26   :  { %79 = vmatpush.msra.mxu0 %v48_v13 }
  0x28   :  { %80 = vmatpush.msra.mxu0 %v47_v14 }
  0x2a   :  { %81 = vmatpush.msra.mxu0 %v46_v15 }
  0x2b   :  { %82 = vmatmul.f32.vlgmr.msra.gmra.mxu0 %v45_v16 }
  0xa8   :  { %v83_v18 = vpop.f32.mrf.mxu0 }
  0xa9   :  { %v84_v19 = vadd.f32 %v124_v17, %v83_v18 }
  0xab   :  { %v86_v20 = vmul.f32 %v84_v19, %v84_v19 }
  0xad   :  { %87 = vadd.xlane.f32.xlu0 %v86_v20 }
 0x120   :  { %v88_v21 = vpop.xlane.xlu0 %87 }
 0x121   :  { %125 = vrsqrt.f32 %v88_v21  ;;  %vm95_vm1 = vweird.f32 %v88_v21 }
 0x127   :  { %v126_v22 = vpop.eup %125 }
 0x128   :  { %v90_v23 = vmul.f32 %v126_v22, %v88_v21  ;;  %vm96_vm0 = vweird.f32 %v126_v22 }
 0x129   :  { %vm97_vm2 = vmor %vm95_vm1, %vm96_vm0 }
 0x12a   :  { %v91_v24 = vmul.f32 %v126_v22, %v90_v23 }
 0x12c   :  { %v92_v25 = vmul.f32 0.5, %v91_v24 }
 0x12e   :  { %v93_v26 = vsub.f32 1.5, %v92_v25 }
 0x130   :  { %v94_v27 = vmul.f32 %v126_v22, %v93_v26 }
 0x132   :  { %v98_v28 = vsel %vm97_vm2, %v126_v22, %v94_v27 }
 0x133   :  { %v99_v29 = vmul.f32 %v98_v28, %v84_v19 }
 0x135   :  { %100 = vst [vmem:[#allocation7] sm:$0xff] %v99_v29 }
 0x136   :  { %111 = dma.vmem_to_hbm [thread:$0]  %s107_s25, 128, %s109_s2, [#allocation4]  }
 0x137   :  { %203 = dma.done.wait [#allocation4], 128  }
 0x138   :  { %204 = vsyncadd [#allocation4], 4294967168 }
 0x139   :  { %116 = vsyncpa [#allocation3], 1 }
 0x13a   :  { %117 = vsyncpa [#allocation6], 1 }
 0x13b   :  { %118 = vsyncpa [#allocation4], 1 }

</bundles_post_ra>
